<compile_context>
chip_gen: v6e
topology: v6e:2x2x1
jax: 0.10.0
libtpu: 0.0.40
codegen_flags: <defaults>
</compile_context>

<pallas_src>
import functools

import jax
import jax.numpy as jnp
from jax import lax
from jax.experimental import pallas as pl
from jax.experimental.pallas import tpu as pltpu


def _double_conv_kernel(x_ref, mask_ref, w1_ref, b1_ref, w2_ref, b2_ref,
                        o_ref, yext_ref, *, w_padded, ext):
    """Fused (3x3 conv + folded-BN + ReLU) x 2 for one image, spatial-on-lanes.

    Hp = H+2, Wp = W+2, L = Hp*Wp, Lext = ext + L + ext (lane axis).
      x_ref:    (1, Cin, Lext)  zero-extended, spatially padded image.
      mask_ref: (1, L)          1.0 on interior grid cells, 0.0 on the ring.
      w1_ref:   (9, Cmid, Cin)  conv1 weights with BN1 scale folded in.
      b1_ref:   (Cmid, 1)       conv1 bias + BN1 shift.
      w2_ref:   (9, Cout, Cmid) conv2 weights with BN2 scale folded in.
      b2_ref:   (Cout, 1)
      o_ref:    (1, Cout, L)    output on the padded grid (wrapper slices the
                                interior out).
      yext_ref: (Cmid, Lext)    VMEM scratch: zero-padded conv1 activation
                                (keeps the intermediate out of HBM).
    """
    L = o_ref.shape[2]                 # Hp * Wp
    wp = w_padded
    cmid = w1_ref.shape[1]

    def conv3x3(load_tap, w_ref, b_ref):
        # Shift-and-matmul: 9 taps, each a (Cout, Cin) x (Cin, L) MXU dot with
        # f32 accumulation; spatial (L) stays on the lane axis throughout.
        acc = None
        for kh in range(3):
            for kw in range(3):
                off = ext + (kh - 1) * wp + (kw - 1)     # static tap offset
                t = jnp.dot(w_ref[kh * 3 + kw], load_tap(off),
                            preferred_element_type=jnp.float32)
                acc = t if acc is None else acc + t
        # Folded-BN epilogue: only bias + ReLU (the scale lives in the weights).
        return jnp.maximum(acc + b_ref[...], 0.0)

    # --- conv1 + BN1 + ReLU over the whole padded grid; zero the pad ring so
    # that conv2 sees proper zero padding of the intermediate. ---
    y = conv3x3(lambda off: x_ref[0, :, off:off + L], w1_ref, b1_ref)
    y = y * mask_ref[...]

    # Rebuild the zero-padded intermediate entirely in VMEM.  Only the two
    # halo regions are zeroed (the interior is fully overwritten just below);
    # kept per-iteration so each megacore's scratch is initialised.
    zeros_halo = jnp.zeros((cmid, ext), jnp.float32)
    yext_ref[:, :ext] = zeros_halo
    yext_ref[:, ext + L:] = zeros_halo
    yext_ref[:, ext:ext + L] = y

    # --- conv2 + BN2 + ReLU. Ring positions of o_ref are discarded by the
    # wrapper, so no mask is needed here. ---
    out = conv3x3(lambda off: yext_ref[:, off:off + L], w2_ref, b2_ref)
    o_ref[0, :, :] = out.astype(o_ref.dtype)


def _fold_bn_into_conv(w, b, gamma, beta, mean, var, eps=1e-5):
    """Fold inference-mode BatchNorm into the conv weight and bias."""
    s = gamma / jnp.sqrt(var + eps)                        # (Cout,)
    w_f = (w * s[:, None, None, None]).astype(jnp.float32)
    b_f = ((b - mean) * s + beta).astype(jnp.float32)
    return w_f, b_f


def double_conv(x, params, *, eps=1e-5):
    """(Conv3x3 + BN + ReLU) x 2, NCHW in / NCHW out, fused Pallas kernel."""
    N, cin, H, W = x.shape
    w1, b1 = _fold_bn_into_conv(params["w1"], params["b1"], params["g1"],
                                params["beta1"], params["m1"], params["v1"], eps)
    w2, b2 = _fold_bn_into_conv(params["w2"], params["b2"], params["g2"],
                                params["beta2"], params["m2"], params["v2"], eps)
    cmid, cout = w1.shape[0], w2.shape[0]

    hp, wp = H + 2, W + 2
    L = hp * wp
    # Lane-aligned halo (>= wp+1) so every tap slice of the flattened grid
    # stays in-bounds and the centre taps start at a 128-lane boundary.
    ext = ((wp + 1 + 127) // 128) * 128
    lext = L + 2 * ext

    # Wrapper-side layout plumbing (XLA fuses it into ~one HBM copy):
    # NCHW -> pad the 1-pixel ring -> flatten spatial onto the lane axis ->
    # add `ext` zero lanes on both ends.
    x_l = jnp.pad(x.astype(jnp.float32), ((0, 0), (0, 0), (1, 1), (1, 1)))
    x_l = x_l.reshape(N, cin, L)
    x_l = jnp.pad(x_l, ((0, 0), (0, 0), (ext, ext)))

    # Interior mask of the padded grid, lane-dense (1, L) (zeros the ring
    # between the two convs).  Grid-invariant, ~1.3 KB.
    idx = jnp.arange(L, dtype=jnp.int32)
    row, col = idx // wp, idx % wp
    interior = (row >= 1) & (row <= H) & (col >= 1) & (col <= W)
    mask = interior.astype(jnp.float32).reshape(1, L)

    # OIHW -> (tap, Cout, Cin) so each tap is a (Cout, Cin) x (Cin, L) matmul.
    w1_k = jnp.transpose(w1, (2, 3, 0, 1)).reshape(9, cmid, cin)
    w2_k = jnp.transpose(w2, (2, 3, 0, 1)).reshape(9, cout, cmid)
    b1_k = b1.reshape(cmid, 1)
    b2_k = b2.reshape(cout, 1)

    kernel = functools.partial(_double_conv_kernel, w_padded=wp, ext=ext)

    out_flat = pl.pallas_call(
        kernel,
        out_shape=jax.ShapeDtypeStruct((N, cout, L), jnp.float32),
        grid=(N,),
        in_specs=[
            pl.BlockSpec((1, cin, lext), lambda n: (n, 0, 0)),
            pl.BlockSpec((1, L), lambda n: (0, 0)),
            pl.BlockSpec((9, cmid, cin), lambda n: (0, 0, 0)),
            pl.BlockSpec((cmid, 1), lambda n: (0, 0)),
            pl.BlockSpec((9, cout, cmid), lambda n: (0, 0, 0)),
            pl.BlockSpec((cout, 1), lambda n: (0, 0)),
        ],
        out_specs=pl.BlockSpec((1, cout, L), lambda n: (n, 0, 0)),
        scratch_shapes=[pltpu.VMEM((cmid, lext), jnp.float32)],
        compiler_params=pltpu.CompilerParams(
            dimension_semantics=("parallel",),
            # Real need here is a few tens of KiB; 32 MiB is the v7x scoped
            # default and leaves headroom on every generation (64 MiB would be
            # the entire physical v7x VMEM).
            vmem_limit_bytes=32 * 1024 * 1024,
        ),
    )(x_l, mask, w1_k, b1_k, w2_k, b2_k)

    # Output is already channel-major: drop the padding ring, no transpose.
    return out_flat.reshape(N, cout, hp, wp)[:, :, 1:H + 1, 1:W + 1]


def _reference(x, p, eps=1e-5):
    """Pure-JAX reference (lax conv) with inference-mode BatchNorm semantics."""
    def block(x, w, cb, g, beta, m, v):
        y = lax.conv_general_dilated(
            x, w, window_strides=(1, 1), padding=((1, 1), (1, 1)),
            dimension_numbers=("NCHW", "OIHW", "NCHW"))
        y = y + cb[None, :, None, None]
        y = (y - m[None, :, None, None]) * (
            g[None, :, None, None] / jnp.sqrt(v[None, :, None, None] + eps))
        y = y + beta[None, :, None, None]
        return jnp.maximum(y, 0.0)

    y = block(x, p["w1"], p["b1"], p["g1"], p["beta1"], p["m1"], p["v1"])
    y = block(y, p["w2"], p["b2"], p["g2"], p["beta2"], p["m2"], p["v2"])
    return y


if __name__ == "__main__":
    N, Cin, Cout, H, W = 2, 3, 1, 16, 16
    key = jax.random.PRNGKey(0)
    k_x, k_w1, k_b1, k_w2, k_b2 = jax.random.split(key, 5)

    x = jax.random.normal(k_x, (N, Cin, H, W), jnp.float32)

    # Conv2d default init: U(-k, k), k = 1/sqrt(fan_in)
    k1 = 1.0 / (Cin * 9) ** 0.5
    k2 = 1.0 / (Cout * 9) ** 0.5
    params = {
        "w1": jax.random.uniform(k_w1, (Cout, Cin, 3, 3), jnp.float32, -k1, k1),
        "b1": jax.random.uniform(k_b1, (Cout,), jnp.float32, -k1, k1),
        "w2": jax.random.uniform(k_w2, (Cout, Cout, 3, 3), jnp.float32, -k2, k2),
        "b2": jax.random.uniform(k_b2, (Cout,), jnp.float32, -k2, k2),
        # BatchNorm2d defaults: gamma=1, beta=0, running_mean=0, running_var=1
        "g1": jnp.ones((Cout,), jnp.float32),
        "beta1": jnp.zeros((Cout,), jnp.float32),
        "m1": jnp.zeros((Cout,), jnp.float32),
        "v1": jnp.ones((Cout,), jnp.float32),
        "g2": jnp.ones((Cout,), jnp.float32),
        "beta2": jnp.zeros((Cout,), jnp.float32),
        "m2": jnp.zeros((Cout,), jnp.float32),
        "v2": jnp.ones((Cout,), jnp.float32),
    }

    out = jax.jit(double_conv)(x, params)
    out = jax.block_until_ready(out)

    ref = _reference(x, params)
    assert out.shape == (N, Cout, H, W), out.shape
    err = float(jnp.max(jnp.abs(out - ref)))
    assert jnp.allclose(out, ref, atol=1e-5, rtol=1e-5), f"mismatch, max_abs_err={err}"

    print("KERNEL_OK")
</pallas_src>

<mosaic_0001>
module attributes {stable_mosaic.version = 11 : i64} {
  func.func @_double_conv_kernel(%arg0: i32, %arg1: memref<1x3x580xf32, #tpu.memory_space<vmem>>, %arg2: memref<1x324xf32, #tpu.memory_space<vmem>>, %arg3: memref<9x1x3xf32, #tpu.memory_space<vmem>>, %arg4: memref<1x1xf32, #tpu.memory_space<vmem>>, %arg5: memref<9x1x1xf32, #tpu.memory_space<vmem>>, %arg6: memref<1x1xf32, #tpu.memory_space<vmem>>, %arg7: memref<1x1x324xf32, #tpu.memory_space<vmem>>, %arg8: memref<1x580xf32, #tpu.memory_space<vmem>>) attributes {dimension_semantics = [#tpu.dimension_semantics<parallel>], iteration_bounds = array<i64: 2>, scalar_prefetch = 0 : i64, scratch_operands = 1 : i64, tpu.core_type = #tpu.core_type<tc>, window_params = [{transform_indices = @transform_0, window_bounds = array<i64: 1, 3, 580>}, {pipeline_mode = #tpu.pipeline_mode<synchronous>, transform_indices = @transform_1, window_bounds = array<i64: 1, 324>}, {pipeline_mode = #tpu.pipeline_mode<synchronous>, transform_indices = @transform_2, window_bounds = array<i64: 9, 1, 3>}, {pipeline_mode = #tpu.pipeline_mode<synchronous>, transform_indices = @transform_3, window_bounds = array<i64: 1, 1>}, {pipeline_mode = #tpu.pipeline_mode<synchronous>, transform_indices = @transform_4, window_bounds = array<i64: 9, 1, 1>}, {pipeline_mode = #tpu.pipeline_mode<synchronous>, transform_indices = @transform_5, window_bounds = array<i64: 1, 1>}, {transform_indices = @transform_6, window_bounds = array<i64: 1, 1, 324>}]} {
    %c0 = arith.constant 0 : index
    %c0_0 = arith.constant 0 : index
    %c0_1 = arith.constant 0 : index
    %0 = vector.load %arg3[%c0, %c0_0, %c0_1] : memref<9x1x3xf32, #tpu.memory_space<vmem>>, vector<1x1x3xf32>
    %1 = vector.shape_cast %0 : vector<1x1x3xf32> to vector<1x3xf32>
    %c0_2 = arith.constant 0 : index
    %c0_3 = arith.constant 0 : index
    %c109 = arith.constant 109 : index
    %2 = vector.load %arg1[%c0_2, %c0_3, %c109] : memref<1x3x580xf32, #tpu.memory_space<vmem>>, vector<1x3x324xf32>
    %3 = vector.shape_cast %2 : vector<1x3x324xf32> to vector<3x324xf32>
    %cst = arith.constant dense<0.000000e+00> : vector<1x324xf32>
    %4 = tpu.matmul %1, %3, %cst {dimension_numbers = #tpu.dot_dimension_numbers<[1], [0], [0], [1], [0, 0, 1, 1], [], []>} : vector<1x3xf32>, vector<3x324xf32>, vector<1x324xf32> -> vector<1x324xf32>
    %c1 = arith.constant 1 : index
    %c0_4 = arith.constant 0 : index
    %c0_5 = arith.constant 0 : index
    %5 = vector.load %arg3[%c1, %c0_4, %c0_5] : memref<9x1x3xf32, #tpu.memory_space<vmem>>, vector<1x1x3xf32>
    %6 = vector.shape_cast %5 : vector<1x1x3xf32> to vector<1x3xf32>
    %c0_6 = arith.constant 0 : index
    %c0_7 = arith.constant 0 : index
    %c110 = arith.constant 110 : index
    %7 = vector.load %arg1[%c0_6, %c0_7, %c110] : memref<1x3x580xf32, #tpu.memory_space<vmem>>, vector<1x3x324xf32>
    %8 = vector.shape_cast %7 : vector<1x3x324xf32> to vector<3x324xf32>
    %cst_8 = arith.constant dense<0.000000e+00> : vector<1x324xf32>
    %9 = tpu.matmul %6, %8, %cst_8 {dimension_numbers = #tpu.dot_dimension_numbers<[1], [0], [0], [1], [0, 0, 1, 1], [], []>} : vector<1x3xf32>, vector<3x324xf32>, vector<1x324xf32> -> vector<1x324xf32>
    %10 = arith.addf %4, %9 : vector<1x324xf32>
    %c2 = arith.constant 2 : index
    %c0_9 = arith.constant 0 : index
    %c0_10 = arith.constant 0 : index
    %11 = vector.load %arg3[%c2, %c0_9, %c0_10] : memref<9x1x3xf32, #tpu.memory_space<vmem>>, vector<1x1x3xf32>
    %12 = vector.shape_cast %11 : vector<1x1x3xf32> to vector<1x3xf32>
    %c0_11 = arith.constant 0 : index
    %c0_12 = arith.constant 0 : index
    %c111 = arith.constant 111 : index
    %13 = vector.load %arg1[%c0_11, %c0_12, %c111] : memref<1x3x580xf32, #tpu.memory_space<vmem>>, vector<1x3x324xf32>
    %14 = vector.shape_cast %13 : vector<1x3x324xf32> to vector<3x324xf32>
    %cst_13 = arith.constant dense<0.000000e+00> : vector<1x324xf32>
    %15 = tpu.matmul %12, %14, %cst_13 {dimension_numbers = #tpu.dot_dimension_numbers<[1], [0], [0], [1], [0, 0, 1, 1], [], []>} : vector<1x3xf32>, vector<3x324xf32>, vector<1x324xf32> -> vector<1x324xf32>
    %16 = arith.addf %10, %15 : vector<1x324xf32>
    %c3 = arith.constant 3 : index
    %c0_14 = arith.constant 0 : index
    %c0_15 = arith.constant 0 : index
    %17 = vector.load %arg3[%c3, %c0_14, %c0_15] : memref<9x1x3xf32, #tpu.memory_space<vmem>>, vector<1x1x3xf32>
    %18 = vector.shape_cast %17 : vector<1x1x3xf32> to vector<1x3xf32>
    %c0_16 = arith.constant 0 : index
    %c0_17 = arith.constant 0 : index
    %c127 = arith.constant 127 : index
    %19 = vector.load %arg1[%c0_16, %c0_17, %c127] : memref<1x3x580xf32, #tpu.memory_space<vmem>>, vector<1x3x324xf32>
    %20 = vector.shape_cast %19 : vector<1x3x324xf32> to vector<3x324xf32>
    %cst_18 = arith.constant dense<0.000000e+00> : vector<1x324xf32>
    %21 = tpu.matmul %18, %20, %cst_18 {dimension_numbers = #tpu.dot_dimension_numbers<[1], [0], [0], [1], [0, 0, 1, 1], [], []>} : vector<1x3xf32>, vector<3x324xf32>, vector<1x324xf32> -> vector<1x324xf32>
    %22 = arith.addf %16, %21 : vector<1x324xf32>
    %c4 = arith.constant 4 : index
    %c0_19 = arith.constant 0 : index
    %c0_20 = arith.constant 0 : index
    %23 = vector.load %arg3[%c4, %c0_19, %c0_20] : memref<9x1x3xf32, #tpu.memory_space<vmem>>, vector<1x1x3xf32>
    %24 = vector.shape_cast %23 : vector<1x1x3xf32> to vector<1x3xf32>
    %c0_21 = arith.constant 0 : index
    %c0_22 = arith.constant 0 : index
    %c128 = arith.constant 128 : index
    %25 = vector.load %arg1[%c0_21, %c0_22, %c128] : memref<1x3x580xf32, #tpu.memory_space<vmem>>, vector<1x3x324xf32>
    %26 = vector.shape_cast %25 : vector<1x3x324xf32> to vector<3x324xf32>
    %cst_23 = arith.constant dense<0.000000e+00> : vector<1x324xf32>
    %27 = tpu.matmul %24, %26, %cst_23 {dimension_numbers = #tpu.dot_dimension_numbers<[1], [0], [0], [1], [0, 0, 1, 1], [], []>} : vector<1x3xf32>, vector<3x324xf32>, vector<1x324xf32> -> vector<1x324xf32>
    %28 = arith.addf %22, %27 : vector<1x324xf32>
    %c5 = arith.constant 5 : index
    %c0_24 = arith.constant 0 : index
    %c0_25 = arith.constant 0 : index
    %29 = vector.load %arg3[%c5, %c0_24, %c0_25] : memref<9x1x3xf32, #tpu.memory_space<vmem>>, vector<1x1x3xf32>
    %30 = vector.shape_cast %29 : vector<1x1x3xf32> to vector<1x3xf32>
    %c0_26 = arith.constant 0 : index
    %c0_27 = arith.constant 0 : index
    %c129 = arith.constant 129 : index
    %31 = vector.load %arg1[%c0_26, %c0_27, %c129] : memref<1x3x580xf32, #tpu.memory_space<vmem>>, vector<1x3x324xf32>
    %32 = vector.shape_cast %31 : vector<1x3x324xf32> to vector<3x324xf32>
    %cst_28 = arith.constant dense<0.000000e+00> : vector<1x324xf32>
    %33 = tpu.matmul %30, %32, %cst_28 {dimension_numbers = #tpu.dot_dimension_numbers<[1], [0], [0], [1], [0, 0, 1, 1], [], []>} : vector<1x3xf32>, vector<3x324xf32>, vector<1x324xf32> -> vector<1x324xf32>
    %34 = arith.addf %28, %33 : vector<1x324xf32>
    %c6 = arith.constant 6 : index
    %c0_29 = arith.constant 0 : index
    %c0_30 = arith.constant 0 : index
    %35 = vector.load %arg3[%c6, %c0_29, %c0_30] : memref<9x1x3xf32, #tpu.memory_space<vmem>>, vector<1x1x3xf32>
    %36 = vector.shape_cast %35 : vector<1x1x3xf32> to vector<1x3xf32>
    %c0_31 = arith.constant 0 : index
    %c0_32 = arith.constant 0 : index
    %c145 = arith.constant 145 : index
    %37 = vector.load %arg1[%c0_31, %c0_32, %c145] : memref<1x3x580xf32, #tpu.memory_space<vmem>>, vector<1x3x324xf32>
    %38 = vector.shape_cast %37 : vector<1x3x324xf32> to vector<3x324xf32>
    %cst_33 = arith.constant dense<0.000000e+00> : vector<1x324xf32>
    %39 = tpu.matmul %36, %38, %cst_33 {dimension_numbers = #tpu.dot_dimension_numbers<[1], [0], [0], [1], [0, 0, 1, 1], [], []>} : vector<1x3xf32>, vector<3x324xf32>, vector<1x324xf32> -> vector<1x324xf32>
    %40 = arith.addf %34, %39 : vector<1x324xf32>
    %c7 = arith.constant 7 : index
    %c0_34 = arith.constant 0 : index
    %c0_35 = arith.constant 0 : index
    %41 = vector.load %arg3[%c7, %c0_34, %c0_35] : memref<9x1x3xf32, #tpu.memory_space<vmem>>, vector<1x1x3xf32>
    %42 = vector.shape_cast %41 : vector<1x1x3xf32> to vector<1x3xf32>
    %c0_36 = arith.constant 0 : index
    %c0_37 = arith.constant 0 : index
    %c146 = arith.constant 146 : index
    %43 = vector.load %arg1[%c0_36, %c0_37, %c146] : memref<1x3x580xf32, #tpu.memory_space<vmem>>, vector<1x3x324xf32>
    %44 = vector.shape_cast %43 : vector<1x3x324xf32> to vector<3x324xf32>
    %cst_38 = arith.constant dense<0.000000e+00> : vector<1x324xf32>
    %45 = tpu.matmul %42, %44, %cst_38 {dimension_numbers = #tpu.dot_dimension_numbers<[1], [0], [0], [1], [0, 0, 1, 1], [], []>} : vector<1x3xf32>, vector<3x324xf32>, vector<1x324xf32> -> vector<1x324xf32>
    %46 = arith.addf %40, %45 : vector<1x324xf32>
    %c8 = arith.constant 8 : index
    %c0_39 = arith.constant 0 : index
    %c0_40 = arith.constant 0 : index
    %47 = vector.load %arg3[%c8, %c0_39, %c0_40] : memref<9x1x3xf32, #tpu.memory_space<vmem>>, vector<1x1x3xf32>
    %48 = vector.shape_cast %47 : vector<1x1x3xf32> to vector<1x3xf32>
    %c0_41 = arith.constant 0 : index
    %c0_42 = arith.constant 0 : index
    %c147 = arith.constant 147 : index
    %49 = vector.load %arg1[%c0_41, %c0_42, %c147] : memref<1x3x580xf32, #tpu.memory_space<vmem>>, vector<1x3x324xf32>
    %50 = vector.shape_cast %49 : vector<1x3x324xf32> to vector<3x324xf32>
    %cst_43 = arith.constant dense<0.000000e+00> : vector<1x324xf32>
    %51 = tpu.matmul %48, %50, %cst_43 {dimension_numbers = #tpu.dot_dimension_numbers<[1], [0], [0], [1], [0, 0, 1, 1], [], []>} : vector<1x3xf32>, vector<3x324xf32>, vector<1x324xf32> -> vector<1x324xf32>
    %52 = arith.addf %46, %51 : vector<1x324xf32>
    %c0_44 = arith.constant 0 : index
    %c0_45 = arith.constant 0 : index
    %53 = vector.load %arg4[%c0_44, %c0_45] : memref<1x1xf32, #tpu.memory_space<vmem>>, vector<1x1xf32>
    %54 = vector.broadcast %53 : vector<1x1xf32> to vector<1x324xf32>
    %55 = arith.addf %52, %54 : vector<1x324xf32>
    %cst_46 = arith.constant 0.000000e+00 : f32
    %56 = vector.broadcast %cst_46 : f32 to vector<1x324xf32>
    %57 = arith.maximumf %55, %56 : vector<1x324xf32>
    %c0_47 = arith.constant 0 : index
    %c0_48 = arith.constant 0 : index
    %58 = vector.load %arg2[%c0_47, %c0_48] : memref<1x324xf32, #tpu.memory_space<vmem>>, vector<1x324xf32>
    %59 = arith.mulf %57, %58 : vector<1x324xf32>
    %cst_49 = arith.constant 0.000000e+00 : f32
    %60 = vector.broadcast %cst_49 : f32 to vector<1x128xf32>
    %c0_50 = arith.constant 0 : index
    %c0_51 = arith.constant 0 : index
    %61 = vector.load %arg8[%c0_50, %c0_51] : memref<1x580xf32, #tpu.memory_space<vmem>>, vector<1x128xf32>
    tpu.vector_store %arg8[%c0_50, %c0_51], %60 {strides = array<i32>} : memref<1x580xf32, #tpu.memory_space<vmem>>, vector<1x128xf32>,
    %c0_52 = arith.constant 0 : index
    %c452 = arith.constant 452 : index
    %62 = vector.load %arg8[%c0_52, %c452] : memref<1x580xf32, #tpu.memory_space<vmem>>, vector<1x128xf32>
    tpu.vector_store %arg8[%c0_52, %c452], %60 {strides = array<i32>} : memref<1x580xf32, #tpu.memory_space<vmem>>, vector<1x128xf32>,
    %c0_53 = arith.constant 0 : index
    %c128_54 = arith.constant 128 : index
    %63 = vector.load %arg8[%c0_53, %c128_54] : memref<1x580xf32, #tpu.memory_space<vmem>>, vector<1x324xf32>
    tpu.vector_store %arg8[%c0_53, %c128_54], %59 {strides = array<i32>} : memref<1x580xf32, #tpu.memory_space<vmem>>, vector<1x324xf32>,
    %c0_55 = arith.constant 0 : index
    %c0_56 = arith.constant 0 : index
    %c0_57 = arith.constant 0 : index
    %64 = vector.load %arg5[%c0_55, %c0_56, %c0_57] : memref<9x1x1xf32, #tpu.memory_space<vmem>>, vector<1x1x1xf32>
    %65 = vector.shape_cast %64 : vector<1x1x1xf32> to vector<1x1xf32>
    %c0_58 = arith.constant 0 : index
    %c109_59 = arith.constant 109 : index
    %66 = vector.load %arg8[%c0_58, %c109_59] : memref<1x580xf32, #tpu.memory_space<vmem>>, vector<1x324xf32>
    %cst_60 = arith.constant dense<0.000000e+00> : vector<1x324xf32>
    %67 = tpu.matmul %65, %66, %cst_60 {dimension_numbers = #tpu.dot_dimension_numbers<[1], [0], [0], [1], [0, 0, 1, 1], [], []>} : vector<1x1xf32>, vector<1x324xf32>, vector<1x324xf32> -> vector<1x324xf32>
    %c1_61 = arith.constant 1 : index
    %c0_62 = arith.constant 0 : index
    %c0_63 = arith.constant 0 : index
    %68 = vector.load %arg5[%c1_61, %c0_62, %c0_63] : memref<9x1x1xf32, #tpu.memory_space<vmem>>, vector<1x1x1xf32>
    %69 = vector.shape_cast %68 : vector<1x1x1xf32> to vector<1x1xf32>
    %c0_64 = arith.constant 0 : index
    %c110_65 = arith.constant 110 : index
    %70 = vector.load %arg8[%c0_64, %c110_65] : memref<1x580xf32, #tpu.memory_space<vmem>>, vector<1x324xf32>
    %cst_66 = arith.constant dense<0.000000e+00> : vector<1x324xf32>
    %71 = tpu.matmul %69, %70, %cst_66 {dimension_numbers = #tpu.dot_dimension_numbers<[1], [0], [0], [1], [0, 0, 1, 1], [], []>} : vector<1x1xf32>, vector<1x324xf32>, vector<1x324xf32> -> vector<1x324xf32>
    %72 = arith.addf %67, %71 : vector<1x324xf32>
    %c2_67 = arith.constant 2 : index
    %c0_68 = arith.constant 0 : index
    %c0_69 = arith.constant 0 : index
    %73 = vector.load %arg5[%c2_67, %c0_68, %c0_69] : memref<9x1x1xf32, #tpu.memory_space<vmem>>, vector<1x1x1xf32>
    %74 = vector.shape_cast %73 : vector<1x1x1xf32> to vector<1x1xf32>
    %c0_70 = arith.constant 0 : index
    %c111_71 = arith.constant 111 : index
    %75 = vector.load %arg8[%c0_70, %c111_71] : memref<1x580xf32, #tpu.memory_space<vmem>>, vector<1x324xf32>
    %cst_72 = arith.constant dense<0.000000e+00> : vector<1x324xf32>
    %76 = tpu.matmul %74, %75, %cst_72 {dimension_numbers = #tpu.dot_dimension_numbers<[1], [0], [0], [1], [0, 0, 1, 1], [], []>} : vector<1x1xf32>, vector<1x324xf32>, vector<1x324xf32> -> vector<1x324xf32>
    %77 = arith.addf %72, %76 : vector<1x324xf32>
    %c3_73 = arith.constant 3 : index
    %c0_74 = arith.constant 0 : index
    %c0_75 = arith.constant 0 : index
    %78 = vector.load %arg5[%c3_73, %c0_74, %c0_75] : memref<9x1x1xf32, #tpu.memory_space<vmem>>, vector<1x1x1xf32>
    %79 = vector.shape_cast %78 : vector<1x1x1xf32> to vector<1x1xf32>
    %c0_76 = arith.constant 0 : index
    %c127_77 = arith.constant 127 : index
    %80 = vector.load %arg8[%c0_76, %c127_77] : memref<1x580xf32, #tpu.memory_space<vmem>>, vector<1x324xf32>
    %cst_78 = arith.constant dense<0.000000e+00> : vector<1x324xf32>
    %81 = tpu.matmul %79, %80, %cst_78 {dimension_numbers = #tpu.dot_dimension_numbers<[1], [0], [0], [1], [0, 0, 1, 1], [], []>} : vector<1x1xf32>, vector<1x324xf32>, vector<1x324xf32> -> vector<1x324xf32>
    %82 = arith.addf %77, %81 : vector<1x324xf32>
    %c4_79 = arith.constant 4 : index
    %c0_80 = arith.constant 0 : index
    %c0_81 = arith.constant 0 : index
    %83 = vector.load %arg5[%c4_79, %c0_80, %c0_81] : memref<9x1x1xf32, #tpu.memory_space<vmem>>, vector<1x1x1xf32>
    %84 = vector.shape_cast %83 : vector<1x1x1xf32> to vector<1x1xf32>
    %c0_82 = arith.constant 0 : index
    %c128_83 = arith.constant 128 : index
    %85 = vector.load %arg8[%c0_82, %c128_83] : memref<1x580xf32, #tpu.memory_space<vmem>>, vector<1x324xf32>
    %cst_84 = arith.constant dense<0.000000e+00> : vector<1x324xf32>
    %86 = tpu.matmul %84, %85, %cst_84 {dimension_numbers = #tpu.dot_dimension_numbers<[1], [0], [0], [1], [0, 0, 1, 1], [], []>} : vector<1x1xf32>, vector<1x324xf32>, vector<1x324xf32> -> vector<1x324xf32>
    %87 = arith.addf %82, %86 : vector<1x324xf32>
    %c5_85 = arith.constant 5 : index
    %c0_86 = arith.constant 0 : index
    %c0_87 = arith.constant 0 : index
    %88 = vector.load %arg5[%c5_85, %c0_86, %c0_87] : memref<9x1x1xf32, #tpu.memory_space<vmem>>, vector<1x1x1xf32>
    %89 = vector.shape_cast %88 : vector<1x1x1xf32> to vector<1x1xf32>
    %c0_88 = arith.constant 0 : index
    %c129_89 = arith.constant 129 : index
    %90 = vector.load %arg8[%c0_88, %c129_89] : memref<1x580xf32, #tpu.memory_space<vmem>>, vector<1x324xf32>
    %cst_90 = arith.constant dense<0.000000e+00> : vector<1x324xf32>
    %91 = tpu.matmul %89, %90, %cst_90 {dimension_numbers = #tpu.dot_dimension_numbers<[1], [0], [0], [1], [0, 0, 1, 1], [], []>} : vector<1x1xf32>, vector<1x324xf32>, vector<1x324xf32> -> vector<1x324xf32>
    %92 = arith.addf %87, %91 : vector<1x324xf32>
    %c6_91 = arith.constant 6 : index
    %c0_92 = arith.constant 0 : index
    %c0_93 = arith.constant 0 : index
    %93 = vector.load %arg5[%c6_91, %c0_92, %c0_93] : memref<9x1x1xf32, #tpu.memory_space<vmem>>, vector<1x1x1xf32>
    %94 = vector.shape_cast %93 : vector<1x1x1xf32> to vector<1x1xf32>
    %c0_94 = arith.constant 0 : index
    %c145_95 = arith.constant 145 : index
    %95 = vector.load %arg8[%c0_94, %c145_95] : memref<1x580xf32, #tpu.memory_space<vmem>>, vector<1x324xf32>
    %cst_96 = arith.constant dense<0.000000e+00> : vector<1x324xf32>
    %96 = tpu.matmul %94, %95, %cst_96 {dimension_numbers = #tpu.dot_dimension_numbers<[1], [0], [0], [1], [0, 0, 1, 1], [], []>} : vector<1x1xf32>, vector<1x324xf32>, vector<1x324xf32> -> vector<1x324xf32>
    %97 = arith.addf %92, %96 : vector<1x324xf32>
    %c7_97 = arith.constant 7 : index
    %c0_98 = arith.constant 0 : index
    %c0_99 = arith.constant 0 : index
    %98 = vector.load %arg5[%c7_97, %c0_98, %c0_99] : memref<9x1x1xf32, #tpu.memory_space<vmem>>, vector<1x1x1xf32>
    %99 = vector.shape_cast %98 : vector<1x1x1xf32> to vector<1x1xf32>
    %c0_100 = arith.constant 0 : index
    %c146_101 = arith.constant 146 : index
    %100 = vector.load %arg8[%c0_100, %c146_101] : memref<1x580xf32, #tpu.memory_space<vmem>>, vector<1x324xf32>
    %cst_102 = arith.constant dense<0.000000e+00> : vector<1x324xf32>
    %101 = tpu.matmul %99, %100, %cst_102 {dimension_numbers = #tpu.dot_dimension_numbers<[1], [0], [0], [1], [0, 0, 1, 1], [], []>} : vector<1x1xf32>, vector<1x324xf32>, vector<1x324xf32> -> vector<1x324xf32>
    %102 = arith.addf %97, %101 : vector<1x324xf32>
    %c8_103 = arith.constant 8 : index
    %c0_104 = arith.constant 0 : index
    %c0_105 = arith.constant 0 : index
    %103 = vector.load %arg5[%c8_103, %c0_104, %c0_105] : memref<9x1x1xf32, #tpu.memory_space<vmem>>, vector<1x1x1xf32>
    %104 = vector.shape_cast %103 : vector<1x1x1xf32> to vector<1x1xf32>
    %c0_106 = arith.constant 0 : index
    %c147_107 = arith.constant 147 : index
    %105 = vector.load %arg8[%c0_106, %c147_107] : memref<1x580xf32, #tpu.memory_space<vmem>>, vector<1x324xf32>
    %cst_108 = arith.constant dense<0.000000e+00> : vector<1x324xf32>
    %106 = tpu.matmul %104, %105, %cst_108 {dimension_numbers = #tpu.dot_dimension_numbers<[1], [0], [0], [1], [0, 0, 1, 1], [], []>} : vector<1x1xf32>, vector<1x324xf32>, vector<1x324xf32> -> vector<1x324xf32>
    %107 = arith.addf %102, %106 : vector<1x324xf32>
    %c0_109 = arith.constant 0 : index
    %c0_110 = arith.constant 0 : index
    %108 = vector.load %arg6[%c0_109, %c0_110] : memref<1x1xf32, #tpu.memory_space<vmem>>, vector<1x1xf32>
    %109 = vector.broadcast %108 : vector<1x1xf32> to vector<1x324xf32>
    %110 = arith.addf %107, %109 : vector<1x324xf32>
    %cst_111 = arith.constant 0.000000e+00 : f32
    %111 = vector.broadcast %cst_111 : f32 to vector<1x324xf32>
    %112 = arith.maximumf %110, %111 : vector<1x324xf32>
    %c0_112 = arith.constant 0 : index
    %c0_113 = arith.constant 0 : index
    %c0_114 = arith.constant 0 : index
    %113 = vector.load %arg7[%c0_112, %c0_113, %c0_114] : memref<1x1x324xf32, #tpu.memory_space<vmem>>, vector<1x1x324xf32>
    %114 = vector.shape_cast %113 : vector<1x1x324xf32> to vector<1x324xf32>
    %115 = vector.shape_cast %112 : vector<1x324xf32> to vector<1x1x324xf32>
    tpu.vector_store %arg7[%c0_112, %c0_113, %c0_114], %115 {strides = array<i32>} : memref<1x1x324xf32, #tpu.memory_space<vmem>>, vector<1x1x324xf32>,
    return
  }
  func.func @transform_0(%arg0: i32) -> (i32, i32, i32) {
    %c0_i32 = arith.constant 0 : i32
    %c0_i32_0 = arith.constant 0 : i32
    %c0_i32_1 = arith.constant 0 : i32
    return %arg0, %c0_i32, %c0_i32_0 : i32, i32, i32
  }
  func.func @transform_1(%arg0: i32) -> (i32, i32) {
    %c0_i32 = arith.constant 0 : i32
    %c0_i32_0 = arith.constant 0 : i32
    %c0_i32_1 = arith.constant 0 : i32
    return %c0_i32, %c0_i32_0 : i32, i32
  }
  func.func @transform_2(%arg0: i32) -> (i32, i32, i32) {
    %c0_i32 = arith.constant 0 : i32
    %c0_i32_0 = arith.constant 0 : i32
    %c0_i32_1 = arith.constant 0 : i32
    %c0_i32_2 = arith.constant 0 : i32
    return %c0_i32, %c0_i32_0, %c0_i32_1 : i32, i32, i32
  }
  func.func @transform_3(%arg0: i32) -> (i32, i32) {
    %c0_i32 = arith.constant 0 : i32
    %c0_i32_0 = arith.constant 0 : i32
    %c0_i32_1 = arith.constant 0 : i32
    return %c0_i32, %c0_i32_0 : i32, i32
  }
  func.func @transform_4(%arg0: i32) -> (i32, i32, i32) {
    %c0_i32 = arith.constant 0 : i32
    %c0_i32_0 = arith.constant 0 : i32
    %c0_i32_1 = arith.constant 0 : i32
    %c0_i32_2 = arith.constant 0 : i32
    return %c0_i32, %c0_i32_0, %c0_i32_1 : i32, i32, i32
  }
  func.func @transform_5(%arg0: i32) -> (i32, i32) {
    %c0_i32 = arith.constant 0 : i32
    %c0_i32_0 = arith.constant 0 : i32
    %c0_i32_1 = arith.constant 0 : i32
    return %c0_i32, %c0_i32_0 : i32, i32
  }
  func.func @transform_6(%arg0: i32) -> (i32, i32, i32) {
    %c0_i32 = arith.constant 0 : i32
    %c0_i32_0 = arith.constant 0 : i32
    %c0_i32_1 = arith.constant 0 : i32
    return %arg0, %c0_i32, %c0_i32_0 : i32, i32, i32
  }
}

</mosaic_0001>

<bundles_post_ra>
// kernel: double_conv.1
= control target key start
LH: loop header
LB: loop body
LE: loop exit
PB: predicated region body
PF: predicated region fallthrough
CT: control target
= control target key end

     0   :  { %s3775_s25 = smov 0   ;;  %s4187_s0 = inlined_call_operand.vmem [shape: f32[2,3,580], index: 0, kind: input, shape index: {}]   ;;  %s4188_s1 = inlined_call_operand.vmem [shape: f32[1,324], index: 1, kind: input, shape index: {}]   ;;  %s4189_s2 = inlined_call_operand.vmem [shape: f32[9,1,3], index: 2, kind: input, shape index: {}]   ;;  %s4190_s3 = inlined_call_operand.<no memory space> [shape: f32[1,1], index: 3, kind: input, shape index: {}]   ;;  %s4191_s4 = inlined_call_operand.vmem [shape: f32[9,1,1], index: 4, kind: input, shape index: {}]   ;;  %s4192_s6 = inlined_call_operand.vmem [shape: f32[2,1,324], index: 6, kind: output, shape index: {}]   ;;  %s4193_s5 = inlined_call_operand.<no memory space> [shape: f32[1,1], index: 5, kind: input, shape index: {}]  }
   0x1   :  { %v11_v0 = vstv %s4190_s3  ;;  %v13_v1 = vstv %s4193_s5 }
   0x2   :  { %12 = vst [vmem:[#allocation3] sm:$0x1] %v11_v0  ;;  %14 = vst [vmem:[#allocation4] sm:$0x1] %v13_v1 }
   0x3 LB: > { %s3440_s26 = sadd.s32 4294967295, %s3720_s25   ;;  %p3444_p0 = scmp.ge.s32.totalorder %s3720_s25, 1  ;;  %s3720_s25 = sphi %s3775_s25, %s20_s25  }
   0x4   : > { %p216_p1 = scmp.lt.s32.totalorder %s3720_s25, 3 }
   0x6   : > { %p217_p2 = pnand %p3444_p0, %p216_p1 }
   0x7   : > { %p245_p3 = scmp.lt.s32.totalorder (!%p217_p2), %s3440_s26, 1  ;;  %s3723_s29 = smov (!%p217_p2), 18  }
   0x8   : > { %220 = sbr.rel (%p217_p2) target bundleno = 792 (0x318), region = 44  ;;  %s3724_s30 = smov (!%p217_p2), 19  }
   0x9   : > { %s3726_s7 = smov (!%p217_p2), 17   ;;  %s3727_s8 = smov (!%p217_p2), 1  }
   0xa   : > { %s3728_s9 = smov (!%p217_p2), 127   ;;  %s3729_s10 = smov (!%p217_p2), 111  }
   0xb   : > { %s3731_s11 = smov (!%p217_p2), 110   ;;  %s3732_s12 = smov (!%p217_p2), 109  }
   0xd   : > { %s4197_s26 = smov (!%p245_p3, %s3440_s26), 1  ;;  %v3722_v2 = vmov 0.0   ;;  %vm3725_vm0 = vmmov 0   ;;  %v3730_v25 = vmov 0   ;;  %v1771_v28 = vld [vmem:[#allocation3] sm:$0x1] }
   0xe   : > { %3590 = vmatprep.subr.mxu1 %v3722_v2  ;;  %350 = vmatprep.mubr.f32.mxu0 %v3722_v2  ;;  %s3680_s3 = smul.u32 20, %s4197_s26  ;;  %vm271_vm1 = vcmask 146432   ;;  %vm279_vm2 = vcmask 1042432   ;;  %vm435_vm3 = vcmask 154624   ;;  %v3446_v38 = vld [vmem:[%s4189_s2 + $0x1] sm:$0x1] }
   0xf   : > { %3592 = vmatprep.mubr.msk.f32.mxu1 %vm3725_vm0, %v3722_v2  ;;  %3702 = vset.pattern.permute.xlu0 %v3730_v25  ;;  %vm275_vm4 = vcmask 23552   ;;  %v254_v43 = vld [vmem:[%s4189_s2] sm:$0x1]  ;;  %vm605_vm5 = vcmask 138240   ;;  %v3457_v50 = vld [vmem:[%s4189_s2 + $0x2] sm:$0x1] }
  0x10   : > { %s3791_s28 = scalar_lea.vmem %s4187_s0, %s3680_s3  ;;  %vm778_vm6 = vcmask 7168   ;;  %v3463_v59 = vld [vmem:[%s4189_s2 + $0x3] sm:$0x1]  ;;  %vm1108_vm7 = vcmask 1039360   ;;  %vm1277_vm8 = vcmask 908288   ;;  %vm1446_vm9 = vcmask 900096  }
  0x11   : > { %v256_v3 = vld [vmem:[%s3791_s28 + $0x8] sm:$0x77]  ;;  %v255_v4 = vld [vmem:[%s3791_s28] sm:$0x77]  ;;  %vm1615_vm10 = vcmask 891904   ;;  %s3681_s27 = smul.u32 3, %s4197_s26 }
  0x12   : > { %267 = vrot.lane.b32.xlu0 %v256_v3, %s3723_s29  ;;  %263 = vrot.lane.b32.xlu1 %v255_v4, %s3723_s29  ;;  %v261_v5 = vcombine.high %v255_v4, %v255_v4  ;;  %v262_v6 = vcombine.high %v256_v3, %v256_v3  ;;  %v591_v7 = vld [vmem:[%s3791_s28] sm:$0x77]  ;;  %v592_v9 = vld [vmem:[%s3791_s28 + $0x8] sm:$0x77] }
  0x13   : > { %v595_v8 = vcombine.high %v591_v7, %v591_v7  ;;  %v764_v10 = vld [vmem:[%s3791_s28] sm:$0x77]  ;;  %v596_v12 = vcombine.high %v592_v9, %v592_v9  ;;  %v765_v13 = vld [vmem:[%s3791_s28 + $0x8] sm:$0x77]  ;;  %s253_s14 = scalar_lea.vmem %s4192_s6, %s3681_s27 }
  0x14   : > { %v768_v11 = vcombine.high %v764_v10, %v764_v10  ;;  %v769_v14 = vcombine.high %v765_v13, %v765_v13  ;;  %v1097_v15 = vld [vmem:[%s3791_s28 + $0x4] sm:$0x77]  ;;  %v1098_v17 = vld [vmem:[%s3791_s28 + $0xc] sm:$0x7] }
  0x15   : > { %v1101_v16 = vcombine.high %v1097_v15, %v1097_v15  ;;  %v1266_v18 = vld [vmem:[%s3791_s28 + $0x4] sm:$0x77]  ;;  %v1267_v20 = vld [vmem:[%s3791_s28 + $0xc] sm:$0x7] }
  0x16   : > { %431 = vrot.lane.b32.xlu0 %v256_v3, %s3724_s30  ;;  %429 = vrot.lane.b32.xlu1 %v261_v5, %s3724_s30  ;;  %v1270_v19 = vcombine.high %v1266_v18, %v1266_v18  ;;  %v1435_v21 = vld [vmem:[%s3791_s28 + $0x4] sm:$0x77]  ;;  %v1436_v23 = vld [vmem:[%s3791_s28 + $0xc] sm:$0x7] }
  0x17   : > { %v1439_v22 = vcombine.high %v1435_v21, %v1435_v21  ;;  %v1604_v24 = vld [vmem:[%s3791_s28 + $0x4] sm:$0x77]  ;;  %v1605_v27 = vld [vmem:[%s3791_s28 + $0xc] sm:$0x7] }
  0x18   : > { %v1608_v26 = vcombine.high %v1604_v24, %v1604_v24  ;;  %v937_v56 = vld [vmem:[%s3791_s28 + $0x4] sm:$0x77]  ;;  %v938_v63 = vld [vmem:[%s3791_s28 + $0xc] sm:$0x7] }
  0x19   : > { %v941_v60 = vcombine.high %v937_v56, %v937_v56 }
  0x1a   : > { %269 = vrot.lane.b32.xlu1 %v262_v6, %s3723_s29  ;;  %265 = vrot.lane.b32.xlu0 %v261_v5, %s3723_s29 }
  0x1e   : > { %599 = vrot.lane.b32.xlu1 %v595_v8, %s3726_s7  ;;  %427 = vrot.lane.b32.xlu0 %v255_v4, %s3724_s30  ;;  %v3469_v4 = vld [vmem:[%s4189_s2 + $0x4] sm:$0x1]  ;;  %v3475_v8 = vld [vmem:[%s4189_s2 + $0x5] sm:$0x1] }
  0x22   : > { %433 = vrot.lane.b32.xlu1 %v262_v6, %s3724_s30  ;;  %601 = vrot.lane.b32.xlu0 %v592_v9, %s3726_s7 }
  0x26   : > { %772 = vrot.lane.b32.xlu1 %v768_v11, %s3727_s8  ;;  %597 = vrot.lane.b32.xlu0 %v591_v7, %s3726_s7 }
  0x2a   : > { %603 = vrot.lane.b32.xlu1 %v596_v12, %s3726_s7  ;;  %774 = vrot.lane.b32.xlu0 %v765_v13, %s3727_s8  ;;  %v3481_v13 = vld [vmem:[%s4189_s2 + $0x6] sm:$0x1] }
  0x2e   : > { %776 = vrot.lane.b32.xlu1 %v769_v14, %s3727_s8  ;;  %770 = vrot.lane.b32.xlu0 %v764_v10, %s3727_s8 }
  0x32   : > { %1106 = vrot.lane.b32.xlu1 %v1098_v17, %s3728_s9  ;;  %1104 = vrot.lane.b32.xlu0 %v1101_v16, %s3728_s9  ;;  %v3487_v17 = vld [vmem:[%s4189_s2 + $0x7] sm:$0x1] }
  0x36   : > { %1273 = vrot.lane.b32.xlu1 %v1270_v19, %s3729_s10  ;;  %1102 = vrot.lane.b32.xlu0 %v1097_v15, %s3728_s9 }
  0x3a   : > { %1271 = vrot.lane.b32.xlu1 %v1266_v18, %s3729_s10  ;;  %1275 = vrot.lane.b32.xlu0 %v1267_v20, %s3729_s10 }
  0x3e   : > { %1444 = vrot.lane.b32.xlu1 %v1436_v23, %s3731_s11  ;;  %1442 = vrot.lane.b32.xlu0 %v1439_v22, %s3731_s11 }
  0x42   : > { %1611 = vrot.lane.b32.xlu1 %v1608_v26, %s3732_s12  ;;  %1440 = vrot.lane.b32.xlu0 %v1435_v21, %s3731_s11  ;;  %v3493_v21 = vld [vmem:[%s4189_s2 + $0x8] sm:$0x1]  ;;  %v1777_v26 = vlaneseq }
  0x44   : > { %vm1812_vm11 = vcmp.ge.s32.totalorder %v1777_v26, 68  ;;  %vm1813_vm12 = vcmp.lt.s32.totalorder %v1777_v26, 196  ;;  %vm1809_vm14 = vcmp.lt.s32.totalorder %v1777_v26, 128  ;;  %vm3991_vm15 = vcmp.lt.s32.totalorder %v1777_v26, 324 }
  0x45   : > { %vm1814_vm13 = vmand %vm1812_vm11, %vm1813_vm12  ;;  %1811 = vst.msk [vmem:[#allocation2] sm:$0x1] %vm1809_vm14, %v3722_v2 }
  0x46   : > { %1609 = vrot.lane.b32.xlu1 %v1604_v24, %s3732_s12  ;;  %1613 = vrot.lane.b32.xlu0 %v1605_v27, %s3732_s12  ;;  %1815 = vst.msk [vmem:[#allocation2 + $0x3] sm:$0x3] %vm1814_vm13, %v3722_v2 }
  0x4a   : > { %1774 = vperm.xlu0 %3702, %v1771_v28  }
  0x84   : > { %v268_v29 = vpop.permute.xlu0 %267  ;;  %v264_v30 = vpop.permute.xlu1 %263 }
  0x88   : > { %v432_v31 = vpop.permute.xlu0 %431  ;;  %v430_v32 = vpop.permute.xlu1 %429 }
  0x89   : > { %v437_v39 = vsel %vm435_vm3, %v430_v32, %v432_v31 }
  0x8c   : > { %v270_v33 = vpop.permute.xlu1 %269  ;;  %v266_v34 = vpop.permute.xlu0 %265 }
  0x8d   : > { %v273_v35 = vsel %vm271_vm1, %v266_v34, %v268_v29  ;;  %v274_v36 = vsel %vm271_vm1, %v268_v29, %v270_v33  ;;  %v272_v37 = vsel %vm271_vm1, %v264_v30, %v266_v34 }
  0x8e   : > { %3447 = vmatprep.subr.msk.mxu0 %vm279_vm2, %v273_v35  ;;  %3591 = vmatpush3.msk.msra.mxu1 %vm279_vm2, %v274_v36 }
  0x8f   : > { %3448 = vmatpush1.msk.msra.mxu0 %vm279_vm2, %v272_v37  ;;  %3595 = vmatprep.subr.mxu1 %v3722_v2 }
  0x90   : > { %v600_v40 = vpop.permute.xlu1 %599  ;;  %3452 = vmatprep.subr.msk.mxu0 %vm279_vm2, %v437_v39  ;;  %v428_v41 = vpop.permute.xlu0 %427  ;;  %3449 = vmatmul.mubr.msk.f32.vlgmr.msra.gmra.mxu0 %vm275_vm4, %v3446_v38 }
  0x91   : > { %v436_v42 = vsel %vm435_vm3, %v428_v41, %v430_v32  ;;  %3593 = vmatmul.mubr.msk.f32.vlgmr.msra.gmra.mxu1 %vm275_vm4, %v3446_v38  ;;  %512 = vmatprep.mubr.f32.mxu0 %v3722_v2 }
  0x92   : > { %3453 = vmatpush1.msk.msra.mxu0 %vm279_vm2, %v436_v42  ;;  %3597 = vmatprep.mubr.msk.f32.mxu1 %vm3725_vm0, %v3722_v2 }
  0x94   : > { %v434_v44 = vpop.permute.xlu1 %433  ;;  %v602_v45 = vpop.permute.xlu0 %601  ;;  %3454 = vmatmul.mubr.msk.f32.vlgmr.msra.gmra.mxu0 %vm275_vm4, %v254_v43 }
  0x95   : > { %v438_v46 = vsel %vm435_vm3, %v432_v31, %v434_v44  ;;  %v607_v47 = vsel %vm605_vm5, %v600_v40, %v602_v45  ;;  %682 = vmatprep.mubr.f32.mxu0 %v3722_v2 }
  0x96   : > { %3596 = vmatpush3.msk.msra.mxu1 %vm279_vm2, %v438_v46  ;;  %3458 = vmatprep.subr.msk.mxu0 %vm279_vm2, %v607_v47 }
  0x97   : > { %3598 = vmatmul.mubr.msk.f32.vlgmr.msra.gmra.mxu1 %vm275_vm4, %v254_v43  ;;  %3600 = vmatprep.subr.mxu1 %v3722_v2 }
  0x98   : > { %v773_v48 = vpop.permute.xlu1 %772  ;;  %v598_v49 = vpop.permute.xlu0 %597  ;;  %3602 = vmatprep.mubr.msk.f32.mxu1 %vm3725_vm0, %v3722_v2 }
  0x99   : > { %v606_v51 = vsel %vm605_vm5, %v598_v49, %v600_v40 }
  0x9a   : > { %3459 = vmatpush1.msk.msra.mxu0 %vm279_vm2, %v606_v51 }
  0x9b   : > { %3460 = vmatmul.mubr.msk.f32.vlgmr.msra.gmra.mxu0 %vm275_vm4, %v3457_v50 }
  0x9c   : > { %v604_v52 = vpop.permute.xlu1 %603  ;;  %v775_v53 = vpop.permute.xlu0 %774  ;;  %855 = vmatprep.mubr.f32.mxu0 %v3722_v2 }
  0x9d   : > { %v608_v54 = vsel %vm605_vm5, %v602_v45, %v604_v52  ;;  %v780_v55 = vsel %vm778_vm6, %v773_v48, %v775_v53 }
  0x9e   : > { %3601 = vmatpush3.msk.msra.mxu1 %vm279_vm2, %v608_v54  ;;  %3464 = vmatprep.subr.msk.mxu0 %vm279_vm2, %v780_v55 }
  0x9f   : > { %3603 = vmatmul.mubr.msk.f32.vlgmr.msra.gmra.mxu1 %vm275_vm4, %v3457_v50  ;;  %3605 = vmatprep.subr.mxu1 %v3722_v2 }
  0xa0   : > { %v777_v57 = vpop.permute.xlu1 %776  ;;  %v771_v58 = vpop.permute.xlu0 %770  ;;  %3607 = vmatprep.mubr.msk.f32.mxu1 %vm3725_vm0, %v3722_v2 }
  0xa1   : > { %v781_v61 = vsel %vm778_vm6, %v775_v53, %v777_v57  ;;  %v779_v62 = vsel %vm778_vm6, %v771_v58, %v773_v48 }
  0xa2   : > { %3465 = vmatpush1.msk.msra.mxu0 %vm279_vm2, %v779_v62  ;;  %3606 = vmatpush3.msk.msra.mxu1 %vm279_vm2, %v781_v61 }
  0xa3   : > { %3466 = vmatmul.mubr.msk.f32.vlgmr.msra.gmra.mxu0 %vm275_vm4, %v3463_v59  ;;  %3608 = vmatmul.mubr.msk.f32.vlgmr.msra.gmra.mxu1 %vm275_vm4, %v3463_v59  ;;  %v3973_v59 = vshrl.u32 %v1777_v26, 7 }
  0xa4   : > { %v1107_v0 = vpop.permute.xlu1 %1106  ;;  %3470 = vmatprep.subr.msk.mxu0 %vm279_vm2, %v941_v60  ;;  %3610 = vmatprep.subr.mxu1 %v3722_v2  ;;  %v1105_v1 = vpop.permute.xlu0 %1104 }
  0xa5   : > { %v1110_v3 = vsel %vm1108_vm7, %v1105_v1, %v1107_v0  ;;  %3471 = vmatpush1.msk.msra.mxu0 %vm279_vm2, %v937_v56  ;;  %3611 = vmatpush3.msk.msra.mxu1 %vm279_vm2, %v938_v63  ;;  %v1865_v26 = vsub.s32 3, %v3973_v59 }
  0xa6   : > { %1015 = vmatprep.mubr.f32.mxu0 %v3722_v2  ;;  %3612 = vmatprep.mubr.msk.f32.mxu1 %vm3725_vm0, %v3722_v2 }
  0xa7   : > { %3476 = vmatprep.subr.msk.mxu0 %vm279_vm2, %v1110_v3  ;;  %3615 = vmatprep.subr.mxu1 %v3722_v2 }
  0xa8   : > { %3472 = vmatmul.mubr.msk.f32.vlgmr.msra.gmra.mxu0 %vm275_vm4, %v3469_v4  ;;  %3613 = vmatmul.mubr.msk.f32.vlgmr.msra.gmra.mxu1 %vm275_vm4, %v3469_v4  ;;  %v1274_v5 = vpop.permute.xlu1 %1273  ;;  %v1103_v6 = vpop.permute.xlu0 %1102 }
  0xa9   : > { %3616 = vmatpush3.msk.msra.mxu1 %vm279_vm2, %v1107_v0  ;;  %v1109_v7 = vsel %vm1108_vm7, %v1103_v6, %v1105_v1  ;;  %1184 = vmatprep.mubr.f32.mxu0 %v3722_v2  ;;  %v3976_v6 = vsub.s32 0, %v3973_v59 }
  0xaa   : > { %3477 = vmatpush1.msk.msra.mxu0 %vm279_vm2, %v1109_v7  ;;  %3617 = vmatprep.mubr.msk.f32.mxu1 %vm3725_vm0, %v3722_v2 }
  0xab   : > { %3620 = vmatprep.subr.mxu1 %v3722_v2 }
  0xac   : > { %3478 = vmatmul.mubr.msk.f32.vlgmr.msra.gmra.mxu0 %vm275_vm4, %v3475_v8  ;;  %3618 = vmatmul.mubr.msk.f32.vlgmr.msra.gmra.mxu1 %vm275_vm4, %v3475_v8  ;;  %v1272_v9 = vpop.permute.xlu1 %1271  ;;  %v1276_v10 = vpop.permute.xlu0 %1275 }
  0xad   : > { %v1278_v11 = vsel %vm1277_vm8, %v1272_v9, %v1274_v5  ;;  %v1279_v12 = vsel %vm1277_vm8, %v1274_v5, %v1276_v10  ;;  %3621 = vmatpush3.msk.msra.mxu1 %vm279_vm2, %v1276_v10  ;;  %3622 = vmatprep.mubr.msk.f32.mxu1 %vm3725_vm0, %v3722_v2 }
  0xae   : > { %3482 = vmatprep.subr.msk.mxu0 %vm279_vm2, %v1279_v12  ;;  %1353 = vmatprep.mubr.f32.mxu0 %v3722_v2 }
  0xaf   : > { %3483 = vmatpush1.msk.msra.mxu0 %vm279_vm2, %v1278_v11  ;;  %3625 = vmatprep.subr.mxu1 %v3722_v2 }
  0xb0   : > { %3623 = vmatmul.mubr.msk.f32.vlgmr.msra.gmra.mxu1 %vm275_vm4, %v3481_v13  ;;  %v1445_v14 = vpop.permute.xlu1 %1444  ;;  %3484 = vmatmul.mubr.msk.f32.vlgmr.msra.gmra.mxu0 %vm275_vm4, %v3481_v13  ;;  %v1443_v15 = vpop.permute.xlu0 %1442 }
  0xb1   : > { %v1448_v16 = vsel %vm1446_vm9, %v1443_v15, %v1445_v14  ;;  %3626 = vmatpush3.msk.msra.mxu1 %vm279_vm2, %v1445_v14  ;;  %3627 = vmatprep.mubr.msk.f32.mxu1 %vm3725_vm0, %v3722_v2 }
  0xb2   : > { %3488 = vmatprep.subr.msk.mxu0 %vm279_vm2, %v1448_v16  ;;  %1522 = vmatprep.mubr.f32.mxu0 %v3722_v2 }
  0xb3   : > { %3630 = vmatprep.subr.mxu1 %v3722_v2 }
  0xb4   : > { %3628 = vmatmul.mubr.msk.f32.vlgmr.msra.gmra.mxu1 %vm275_vm4, %v3487_v17  ;;  %v1612_v18 = vpop.permute.xlu1 %1611  ;;  %v1441_v19 = vpop.permute.xlu0 %1440 }
  0xb5   : > { %v1447_v20 = vsel %vm1446_vm9, %v1441_v19, %v1443_v15  ;;  %3632 = vmatprep.mubr.msk.f32.mxu1 %vm3725_vm0, %v3722_v2 }
  0xb6   : > { %3489 = vmatpush1.msk.msra.mxu0 %vm279_vm2, %v1447_v20 }
  0xb7   : > { %3490 = vmatmul.mubr.msk.f32.vlgmr.msra.gmra.mxu0 %vm275_vm4, %v3487_v17 }
  0xb8   : > { %v1610_v22 = vpop.permute.xlu1 %1609  ;;  %v1614_v23 = vpop.permute.xlu0 %1613  ;;  %1691 = vmatprep.mubr.f32.mxu0 %v3722_v2 }
  0xb9   : > { %v1616_v24 = vsel %vm1615_vm10, %v1610_v22, %v1612_v18  ;;  %v1617_v25 = vsel %vm1615_vm10, %v1612_v18, %v1614_v23  ;;  %3631 = vmatpush3.msk.msra.mxu1 %vm279_vm2, %v1614_v23  ;;  %v1799_v22 = vsub.s32 2, %v3973_v59  ;;  %v3733_v23 = vmov 1966171168  }
  0xba   : > { %3494 = vmatprep.subr.msk.mxu0 %vm279_vm2, %v1617_v25  ;;  %3633 = vmatmul.mubr.msk.f32.vlgmr.msra.gmra.mxu1 %vm275_vm4, %v3493_v21 }
  0xbb   : > { %3495 = vmatpush1.msk.msra.mxu0 %vm279_vm2, %v1616_v24  ;;  %3635 = vmatprep.subr.mxu1 %v3722_v2  ;;  %v1821_v24 = vunpack.c.l.s4 %v3733_v23  ;;  %vm1881_vm2 = vcmask 1040384  }
  0xbc   : > { %3496 = vmatmul.mubr.msk.f32.vlgmr.msra.gmra.mxu0 %vm275_vm4, %v3493_v21  ;;  %3637 = vmatprep.mubr.msk.f32.mxu1 %vm3725_vm0, %v3722_v2 }
  0xbd   : > { %1952 = vmatprep.mubr.f32.mxu0 %v3722_v2 }
  0xc5   : > { %v1775_v8 = vpop.permute.xlu0 %1774 }
  0xc6   : > { %v1780_v17 = vrot.slane %v1775_v8, %v3976_v6 }
 0x150   : > { %v352_v27 = vpop.f32.mrf.mxu0 }
 0x151   : > { %v423_v28 = vpop.f32.mrf.mxu1 }
 0x152   : > { %v354_v29 = vpop.f32.mrf.mxu0 }
 0x153   : > { %v3594_v30 = vpop.f32.mrf.mxu1 }
 0x154   : > { %v514_v31 = vpop.f32.mrf.mxu0 }
 0x155   : > { %v515_v51 = vadd.f32 %v514_v31, %v352_v27 }
 0x156   : > { %v516_v33 = vpop.f32.mrf.mxu0 }
 0x157   : > { %v585_v32 = vpop.f32.mrf.mxu1  ;;  %v517_v54 = vadd.f32 %v516_v33, %v354_v29  ;;  %v1787_v29 = vld [vmem:[%s4188_s1] sm:$0x7] }
 0x158   : > { %v586_v43 = vadd.f32 %v585_v32, %v423_v28  ;;  %v1795_v32 = vsub.s32 1, %v3973_v59 }
 0x159   : > { %v3599_v34 = vpop.f32.mrf.mxu1 }
 0x15b   : > { %v684_v35 = vpop.f32.mrf.mxu0 }
 0x15c   : > { %v759_v57 = vadd.f32 %v684_v35, %v515_v51 }
 0x15d   : > { %v686_v37 = vpop.f32.mrf.mxu0 }
 0x15e   : > { %v760_v61 = vadd.f32 %v686_v37, %v517_v54  ;;  %v1822_v37 = vunpack.c.0.s8 %v1821_v24 }
 0x15f   : > { %v755_v36 = vpop.f32.mrf.mxu1 }
 0x160   : > { %v761_v48 = vadd.f32 %v755_v36, %v586_v43  ;;  %v1800_v36 = vrot.slane %v1787_v29, %v1799_v22 }
 0x161   : > { %v3604_v38 = vpop.f32.mrf.mxu1 }
 0x162   : > { %v1792_v38 = vrot.slane %v1787_v29, %v3976_v6 }
 0x163   : > { %v857_v39 = vpop.f32.mrf.mxu0  ;;  %v928_v40 = vpop.f32.mrf.mxu1 }
 0x164   : > { %v934_v55 = vadd.f32 %v928_v40, %v761_v48  ;;  %v932_v62 = vadd.f32 %v857_v39, %v759_v57 }
 0x165   : > { %v859_v41 = vpop.f32.mrf.mxu0  ;;  %v3609_v42 = vpop.f32.mrf.mxu1 }
 0x166   : > { %v933_v1 = vadd.f32 %v859_v41, %v760_v61  ;;  %v1796_v42 = vrot.slane %v1787_v29, %v1795_v32 }
 0x168   : > { %v1017_v44 = vpop.f32.mrf.mxu0  ;;  %v1088_v45 = vpop.f32.mrf.mxu1 }
 0x169   : > { %v1094_v63 = vadd.f32 %v1088_v45, %v934_v55  ;;  %v1092_v3 = vadd.f32 %v1017_v44, %v932_v62  ;;  %v3986_v44 = vsub.s32 %v1822_v37, %v3973_v59 }
 0x16a   : > { %v1019_v46 = vpop.f32.mrf.mxu0  ;;  %v3614_v47 = vpop.f32.mrf.mxu1 }
 0x16b   : > { %v1093_v9 = vadd.f32 %v1019_v46, %v933_v1 }
 0x16c   : > { %v1186_v49 = vpop.f32.mrf.mxu0  ;;  %v1257_v50 = vpop.f32.mrf.mxu1 }
 0x16d   : > { %v1263_v4 = vadd.f32 %v1257_v50, %v1094_v63  ;;  %v1261_v10 = vadd.f32 %v1186_v49, %v1092_v3  ;;  %v3343_v63 = vld [vmem:[#allocation4] sm:$0x1] }
 0x16e   : > { %v1188_v52 = vpop.f32.mrf.mxu0  ;;  %v3619_v53 = vpop.f32.mrf.mxu1 }
 0x16f   : > { %v1262_v13 = vadd.f32 %v1188_v52, %v1093_v9 }
 0x170   : > { %v1426_v56 = vpop.f32.mrf.mxu1  ;;  %v1355_v58 = vpop.f32.mrf.mxu0 }
 0x171   : > { %v1432_v11 = vadd.f32 %v1426_v56, %v1263_v4  ;;  %v1430_v14 = vadd.f32 %v1355_v58, %v1261_v10 }
 0x172   : > { %v3624_v60 = vpop.f32.mrf.mxu1  ;;  %v1357_v5 = vpop.f32.mrf.mxu0 }
 0x173   : > { %v1431_v19 = vadd.f32 %v1357_v5, %v1262_v13  ;;  %v1846_v13 = vld [vmem:[%s4191_s4] sm:$0x1] }
 0x174   : > { %v1595_v0 = vpop.f32.mrf.mxu1 }
 0x175   : > { %v1601_v15 = vadd.f32 %v1595_v0, %v1432_v11 }
 0x176   : > { %v3629_v7 = vpop.f32.mrf.mxu1 }
 0x177   : > { %v1524_v12 = vpop.f32.mrf.mxu0  ;;  %v3499_v7 = vld [vmem:[%s4191_s4 + $0x1] sm:$0x1] }
 0x178   : > { %v1599_v20 = vadd.f32 %v1524_v12, %v1430_v14 }
 0x179   : > { %v1526_v16 = vpop.f32.mrf.mxu0 }
 0x17a   : > { %v1764_v18 = vpop.f32.mrf.mxu1  ;;  %v1600_v28 = vadd.f32 %v1526_v16, %v1431_v19 }
 0x17b   : > { %v1770_v21 = vadd.f32 %v1764_v18, %v1601_v15 }
 0x17c   : > { %v1693_v25 = vpop.f32.mrf.mxu0  ;;  %v3634_v27 = vpop.f32.mrf.mxu1 }
 0x17d   : > { %v1783_v30 = vadd.f32 %v1780_v17, %v1770_v21  ;;  %v1768_v31 = vadd.f32 %v1693_v25, %v1599_v20  ;;  %v3510_v21 = vld [vmem:[%s4191_s4 + $0x2] sm:$0x1] }
 0x17e   : > { %v1695_v33 = vpop.f32.mrf.mxu0 }
 0x17f   : > { %v1781_v34 = vadd.f32 %v1780_v17, %v1768_v31  ;;  %v1769_v35 = vadd.f32 %v1695_v33, %v1600_v28  ;;  %v1786_v39 = vmax.f32 %v1783_v30, 0.0  ;;  %v3516_v30 = vld [vmem:[%s4191_s4 + $0x3] sm:$0x1] }
 0x181   : > { %v1784_v40 = vmax.f32 %v1781_v34, 0.0  ;;  %v1782_v41 = vadd.f32 %v1780_v17, %v1769_v35  ;;  %v1806_v45 = vmul.f32 %v1800_v36, %v1786_v39  ;;  %v3522_v34 = vld [vmem:[%s4191_s4 + $0x4] sm:$0x1] }
 0x183   : > { %v1785_v43 = vmax.f32 %v1782_v41, 0.0  ;;  %v1804_v46 = vmul.f32 %v1792_v38, %v1784_v40  ;;  %v1833_v49 = vrot.slane %v1806_v45, %v3986_v44  ;;  %v3528_v41 = vld [vmem:[%s4191_s4 + $0x5] sm:$0x1] }
 0x185   : > { %v1805_v47 = vmul.f32 %v1796_v42, %v1785_v43 }
 0x187   : > { %v1819_v48 = vcombine.low %v1804_v46, %v1805_v47 }
 0x189   : > { %v1826_v50 = vrot.slane %v1819_v48, %v3986_v44  ;;  %v3534_v48 = vld [vmem:[%s4191_s4 + $0x6] sm:$0x1] }
 0x18b   : > { %v1834_v51 = vcombine.low %v1826_v50, %v1833_v49 }
 0x18d   : > { %v1841_v53 = vrot.slane %v1834_v51, %v3986_v44 }
 0x18f   : > { %1845 = vst.msk [vmem:[#allocation2 + $0x1] sm:$0x7] %vm3991_vm15, %v1841_v53  ;;  %v3540_v53 = vld [vmem:[%s4191_s4 + $0x7] sm:$0x1] }
 0x196   : > { %v1847_v54 = vld [vmem:[#allocation2] sm:$0xf] }
 0x197   : > { %v1858_v55 = vrot.slane %v1847_v54, %v1795_v32  ;;  %v1854_v56 = vrot.slane %v1847_v54, %v3976_v6  ;;  %v1862_v57 = vrot.slane %v1847_v54, %v1799_v22  ;;  %v1866_v58 = vrot.slane %v1847_v54, %v1865_v26  ;;  %v2524_v60 = vld [vmem:[#allocation2 + $0x1] sm:$0x7]  ;;  %v3546_v26 = vld [vmem:[%s4191_s4 + $0x8] sm:$0x1] }
 0x198   : > { %v4014_v59 = vrot.slane %v2524_v60, %v1795_v32  ;;  %v4020_v61 = vrot.slane %v2524_v60, %v3976_v6  ;;  %v4025_v62 = vrot.slane %v2524_v60, %v1799_v22 }
 0x199   : > { %1869 = vrot.lane.b32.xlu1 %v1858_v55, %s3723_s29  ;;  %1867 = vrot.lane.b32.xlu0 %v1854_v56, %s3723_s29 }
 0x19d   : > { %1871 = vrot.lane.b32.xlu1 %v1862_v57, %s3723_s29  ;;  %2033 = vrot.lane.b32.xlu0 %v1862_v57, %s3724_s30 }
 0x1a1   : > { %2031 = vrot.lane.b32.xlu1 %v1858_v55, %s3724_s30  ;;  %2029 = vrot.lane.b32.xlu0 %v1854_v56, %s3724_s30 }
 0x1a5   : > { %1873 = vrot.lane.b32.xlu1 %v1866_v58, %s3723_s29  ;;  %2196 = vrot.lane.b32.xlu0 %v1862_v57, %s3726_s7 }
 0x1a9   : > { %2194 = vrot.lane.b32.xlu1 %v1858_v55, %s3726_s7  ;;  %2192 = vrot.lane.b32.xlu0 %v1854_v56, %s3726_s7 }
 0x1ad   : > { %2035 = vrot.lane.b32.xlu1 %v1866_v58, %s3724_s30  ;;  %2362 = vrot.lane.b32.xlu0 %v1862_v57, %s3727_s8 }
 0x1b1   : > { %2360 = vrot.lane.b32.xlu1 %v1858_v55, %s3727_s8  ;;  %2358 = vrot.lane.b32.xlu0 %v1854_v56, %s3727_s8 }
 0x1b5   : > { %2198 = vrot.lane.b32.xlu1 %v1866_v58, %s3726_s7  ;;  %2695 = vrot.lane.b32.xlu0 %v4014_v59, %s3728_s9 }
 0x1b9   : > { %2364 = vrot.lane.b32.xlu1 %v1866_v58, %s3727_s8  ;;  %2693 = vrot.lane.b32.xlu0 %v4020_v61, %s3728_s9 }
 0x1bd   : > { %2697 = vrot.lane.b32.xlu1 %v4025_v62, %s3728_s9  ;;  %2860 = vrot.lane.b32.xlu0 %v4025_v62, %s3729_s10 }
 0x1c1   : > { %2858 = vrot.lane.b32.xlu1 %v4014_v59, %s3729_s10  ;;  %3021 = vrot.lane.b32.xlu0 %v4014_v59, %s3731_s11 }
 0x1c5   : > { %2856 = vrot.lane.b32.xlu1 %v4020_v61, %s3729_s10  ;;  %3019 = vrot.lane.b32.xlu0 %v4020_v61, %s3731_s11 }
 0x1c9   : > { %3023 = vrot.lane.b32.xlu1 %v4025_v62, %s3731_s11  ;;  %3186 = vrot.lane.b32.xlu0 %v4025_v62, %s3732_s12 }
 0x1cd   : > { %3184 = vrot.lane.b32.xlu1 %v4014_v59, %s3732_s12  ;;  %3346 = vperm.xlu0 %3702, %v3343_v63  }
 0x1d1   : > { %3182 = vrot.lane.b32.xlu1 %v4020_v61, %s3732_s12 }
 0x20b   : > { %v1870_v0 = vpop.permute.xlu1 %1869  ;;  %v1868_v1 = vpop.permute.xlu0 %1867 }
 0x20c   : > { %v1875_v8 = vsel %vm271_vm1, %v1868_v1, %v1870_v0 }
 0x20f   : > { %v1872_v3 = vpop.permute.xlu1 %1871  ;;  %v2034_v4 = vpop.permute.xlu0 %2033 }
 0x210   : > { %v1876_v5 = vsel %vm271_vm1, %v1870_v0, %v1872_v3 }
 0x211   : > { %3500 = vmatprep.subr.msk.mxu0 %vm1881_vm2, %v1876_v5 }
 0x212   : > { %3501 = vmatpush1.msk.msra.mxu0 %vm1881_vm2, %v1875_v8 }
 0x213   : > { %v2032_v9 = vpop.permute.xlu1 %2031  ;;  %v2030_v10 = vpop.permute.xlu0 %2029  ;;  %3502 = vmatmul.mubr.msk.f32.vlgmr.msra.gmra.mxu0 %vm778_vm6, %v3499_v7 }
 0x214   : > { %v2038_v11 = vsel %vm435_vm3, %v2032_v9, %v2034_v4  ;;  %v2037_v12 = vsel %vm435_vm3, %v2030_v10, %v2032_v9  ;;  %2113 = vmatprep.mubr.f32.mxu0 %v3722_v2 }
 0x215   : > { %3505 = vmatprep.subr.msk.mxu0 %vm1881_vm2, %v2038_v11 }
 0x216   : > { %3506 = vmatpush1.msk.msra.mxu0 %vm1881_vm2, %v2037_v12 }
 0x217   : > { %v1874_v14 = vpop.permute.xlu1 %1873  ;;  %v2197_v15 = vpop.permute.xlu0 %2196  ;;  %3507 = vmatmul.mubr.msk.f32.vlgmr.msra.gmra.mxu0 %vm778_vm6, %v1846_v13 }
 0x218   : > { %v1877_v16 = vsel %vm271_vm1, %v1872_v3, %v1874_v14  ;;  %2276 = vmatprep.mubr.f32.mxu0 %v3722_v2 }
 0x219   : > { %3636 = vmatpush3.msk.msra.mxu1 %vm1881_vm2, %v1877_v16 }
 0x21a   : > { %3640 = vmatprep.subr.mxu1 %v3722_v2  ;;  %3638 = vmatmul.mubr.msk.f32.vlgmr.msra.gmra.mxu1 %vm778_vm6, %v3499_v7 }
 0x21b   : > { %v2195_v17 = vpop.permute.xlu1 %2194  ;;  %v2193_v18 = vpop.permute.xlu0 %2192  ;;  %3642 = vmatprep.mubr.msk.f32.mxu1 %vm3725_vm0, %v3722_v2 }
 0x21c   : > { %v2201_v19 = vsel %vm605_vm5, %v2195_v17, %v2197_v15  ;;  %v2200_v20 = vsel %vm605_vm5, %v2193_v18, %v2195_v17 }
 0x21d   : > { %3511 = vmatprep.subr.msk.mxu0 %vm1881_vm2, %v2201_v19 }
 0x21e   : > { %3512 = vmatpush1.msk.msra.mxu0 %vm1881_vm2, %v2200_v20 }
 0x21f   : > { %v2036_v22 = vpop.permute.xlu1 %2035  ;;  %v2363_v23 = vpop.permute.xlu0 %2362  ;;  %3513 = vmatmul.mubr.msk.f32.vlgmr.msra.gmra.mxu0 %vm778_vm6, %v3510_v21 }
 0x220   : > { %v2039_v24 = vsel %vm435_vm3, %v2034_v4, %v2036_v22  ;;  %2442 = vmatprep.mubr.f32.mxu0 %v3722_v2 }
 0x221   : > { %3641 = vmatpush3.msk.msra.mxu1 %vm1881_vm2, %v2039_v24 }
 0x222   : > { %3643 = vmatmul.mubr.msk.f32.vlgmr.msra.gmra.mxu1 %vm778_vm6, %v1846_v13  ;;  %3645 = vmatprep.subr.mxu1 %v3722_v2 }
 0x223   : > { %v2361_v25 = vpop.permute.xlu1 %2360  ;;  %v2359_v27 = vpop.permute.xlu0 %2358  ;;  %3647 = vmatprep.mubr.msk.f32.mxu1 %vm3725_vm0, %v3722_v2 }
 0x224   : > { %v2367_v28 = vsel %vm778_vm6, %v2361_v25, %v2363_v23  ;;  %v2366_v29 = vsel %vm778_vm6, %v2359_v27, %v2361_v25 }
 0x225   : > { %3517 = vmatprep.subr.msk.mxu0 %vm1881_vm2, %v2367_v28 }
 0x226   : > { %3518 = vmatpush1.msk.msra.mxu0 %vm1881_vm2, %v2366_v29 }
 0x227   : > { %v2199_v31 = vpop.permute.xlu1 %2198  ;;  %3523 = vmatprep.subr.msk.mxu0 %vm1881_vm2, %v4014_v59  ;;  %v2696_v32 = vpop.permute.xlu0 %2695  ;;  %3519 = vmatmul.mubr.msk.f32.vlgmr.msra.gmra.mxu0 %vm778_vm6, %v3516_v30 }
 0x228   : > { %v2202_v33 = vsel %vm605_vm5, %v2197_v15, %v2199_v31  ;;  %3524 = vmatpush1.msk.msra.mxu0 %vm1881_vm2, %v4020_v61  ;;  %2611 = vmatprep.mubr.f32.mxu0 %v3722_v2 }
 0x229   : > { %3646 = vmatpush3.msk.msra.mxu1 %vm1881_vm2, %v2202_v33 }
 0x22a   : > { %3648 = vmatmul.mubr.msk.f32.vlgmr.msra.gmra.mxu1 %vm778_vm6, %v3510_v21  ;;  %3650 = vmatprep.subr.mxu1 %v3722_v2 }
 0x22b   : > { %v2365_v35 = vpop.permute.xlu1 %2364  ;;  %v2694_v36 = vpop.permute.xlu0 %2693  ;;  %3652 = vmatprep.mubr.msk.f32.mxu1 %vm3725_vm0, %v3722_v2  ;;  %3525 = vmatmul.mubr.msk.f32.vlgmr.msra.gmra.mxu0 %vm778_vm6, %v3522_v34 }
 0x22c   : > { %v2368_v37 = vsel %vm778_vm6, %v2363_v23, %v2365_v35  ;;  %2774 = vmatprep.mubr.f32.mxu0 %v3722_v2  ;;  %v2699_v42 = vsel %vm1108_vm7, %v2694_v36, %v2696_v32 }
 0x22d   : > { %3651 = vmatpush3.msk.msra.mxu1 %vm1881_vm2, %v2368_v37 }
 0x22e   : > { %3653 = vmatmul.mubr.msk.f32.vlgmr.msra.gmra.mxu1 %vm778_vm6, %v3516_v30  ;;  %3655 = vmatprep.subr.mxu1 %v3722_v2 }
 0x22f   : > { %v2698_v38 = vpop.permute.xlu1 %2697  ;;  %3656 = vmatpush3.msk.msra.mxu1 %vm1881_vm2, %v4025_v62  ;;  %v2861_v39 = vpop.permute.xlu0 %2860  ;;  %3657 = vmatprep.mubr.msk.f32.mxu1 %vm3725_vm0, %v3722_v2 }
 0x230   : > { %v2700_v40 = vsel %vm1108_vm7, %v2696_v32, %v2698_v38  ;;  %3660 = vmatprep.subr.mxu1 %v3722_v2 }
 0x231   : > { %3529 = vmatprep.subr.msk.mxu0 %vm1881_vm2, %v2700_v40 }
 0x232   : > { %3658 = vmatmul.mubr.msk.f32.vlgmr.msra.gmra.mxu1 %vm778_vm6, %v3522_v34  ;;  %3530 = vmatpush1.msk.msra.mxu0 %vm1881_vm2, %v2699_v42 }
 0x233   : > { %3661 = vmatpush3.msk.msra.mxu1 %vm1881_vm2, %v2698_v38  ;;  %v2859_v43 = vpop.permute.xlu1 %2858  ;;  %3531 = vmatmul.mubr.msk.f32.vlgmr.msra.gmra.mxu0 %vm778_vm6, %v3528_v41  ;;  %v3022_v45 = vpop.permute.xlu0 %3021 }
 0x234   : > { %v2863_v46 = vsel %vm1277_vm8, %v2859_v43, %v2861_v39  ;;  %3662 = vmatprep.mubr.msk.f32.mxu1 %vm3725_vm0, %v3722_v2  ;;  %3665 = vmatprep.subr.mxu1 %v3722_v2 }
 0x235   : > { %3535 = vmatprep.subr.msk.mxu0 %vm1881_vm2, %v2863_v46  ;;  %2937 = vmatprep.mubr.f32.mxu0 %v3722_v2 }
 0x236   : > { %3663 = vmatmul.mubr.msk.f32.vlgmr.msra.gmra.mxu1 %vm778_vm6, %v3528_v41 }
 0x237   : > { %3666 = vmatpush3.msk.msra.mxu1 %vm1881_vm2, %v2861_v39  ;;  %v2857_v47 = vpop.permute.xlu1 %2856  ;;  %3667 = vmatprep.mubr.msk.f32.mxu1 %vm3725_vm0, %v3722_v2  ;;  %v3020_v50 = vpop.permute.xlu0 %3019 }
 0x238   : > { %v2862_v49 = vsel %vm1277_vm8, %v2857_v47, %v2859_v43  ;;  %3670 = vmatprep.subr.mxu1 %v3722_v2  ;;  %v3025_v55 = vsel %vm1446_vm9, %v3020_v50, %v3022_v45 }
 0x239   : > { %3536 = vmatpush1.msk.msra.mxu0 %vm1881_vm2, %v2862_v49 }
 0x23a   : > { %3537 = vmatmul.mubr.msk.f32.vlgmr.msra.gmra.mxu0 %vm778_vm6, %v3534_v48  ;;  %3668 = vmatmul.mubr.msk.f32.vlgmr.msra.gmra.mxu1 %vm778_vm6, %v3534_v48 }
 0x23b   : > { %v3024_v51 = vpop.permute.xlu1 %3023  ;;  %3672 = vmatprep.mubr.msk.f32.mxu1 %vm3725_vm0, %v3722_v2  ;;  %3100 = vmatprep.mubr.f32.mxu0 %v3722_v2  ;;  %v3187_v56 = vpop.permute.xlu0 %3186 }
 0x23c   : > { %v3026_v54 = vsel %vm1446_vm9, %v3022_v45, %v3024_v51  ;;  %3671 = vmatpush3.msk.msra.mxu1 %vm1881_vm2, %v3024_v51 }
 0x23d   : > { %3541 = vmatprep.subr.msk.mxu0 %vm1881_vm2, %v3026_v54  ;;  %3675 = vmatprep.subr.mxu1 %v3722_v2 }
 0x23e   : > { %3542 = vmatpush1.msk.msra.mxu0 %vm1881_vm2, %v3025_v55  ;;  %3673 = vmatmul.mubr.msk.f32.vlgmr.msra.gmra.mxu1 %vm778_vm6, %v3540_v53 }
 0x23f   : > { %3676 = vmatpush3.msk.msra.mxu1 %vm1881_vm2, %v3187_v56  ;;  %v3185_v57 = vpop.permute.xlu1 %3184  ;;  %3543 = vmatmul.mubr.msk.f32.vlgmr.msra.gmra.mxu0 %vm778_vm6, %v3540_v53 }
 0x240   : > { %v3189_v58 = vsel %vm1615_vm10, %v3185_v57, %v3187_v56  ;;  %3677 = vmatprep.mubr.msk.f32.mxu1 %vm3725_vm0, %v3722_v2  ;;  %3263 = vmatprep.mubr.f32.mxu0 %v3722_v2 }
 0x241   : > { %3547 = vmatprep.subr.msk.mxu0 %vm1881_vm2, %v3189_v58 }
 0x242   : > { %3678 = vmatmul.mubr.msk.f32.vlgmr.msra.gmra.mxu1 %vm778_vm6, %v3546_v26 }
 0x243   : > { %v3183_v60 = vpop.permute.xlu1 %3182 }
 0x244   : > { %v3188_v59 = vsel %vm1615_vm10, %v3183_v60, %v3185_v57 }
 0x245   : > { %3548 = vmatpush1.msk.msra.mxu0 %vm1881_vm2, %v3188_v59 }
 0x246   : > { %3549 = vmatmul.mubr.msk.f32.vlgmr.msra.gmra.mxu0 %vm778_vm6, %v3546_v26 }
 0x248   : > { %v3347_v47 = vpop.permute.xlu0 %3346 }
 0x249   : > { %v3352_v26 = vrot.slane %v3347_v47, %v3976_v6 }
 0x2d3   : > { %v1954_v61 = vpop.f32.mrf.mxu0 }
 0x2d5   : > { %v1956_v62 = vpop.f32.mrf.mxu0 }
 0x2d7   : > { %v2115_v63 = vpop.f32.mrf.mxu0 }
 0x2d8   : > { %v2116_v17 = vadd.f32 %v2115_v63, %v1954_v61 }
 0x2d9   : > { %v2117_v1 = vpop.f32.mrf.mxu0 }
 0x2da   : > { %v2025_v0 = vpop.f32.mrf.mxu1  ;;  %v2118_v21 = vadd.f32 %v2117_v1, %v1956_v62 }
 0x2dc   : > { %v3639_v3 = vpop.f32.mrf.mxu1 }
 0x2df   : > { %v2278_v4 = vpop.f32.mrf.mxu0 }
 0x2e0   : > { %v2353_v23 = vadd.f32 %v2278_v4, %v2116_v17 }
 0x2e1   : > { %v2280_v2 = vpop.f32.mrf.mxu0 }
 0x2e2   : > { %v2186_v5 = vpop.f32.mrf.mxu1  ;;  %v2354_v28 = vadd.f32 %v2280_v2, %v2118_v21 }
 0x2e3   : > { %v2187_v18 = vadd.f32 %v2186_v5, %v2025_v0 }
 0x2e4   : > { %v3644_v7 = vpop.f32.mrf.mxu1 }
 0x2e7   : > { %v2444_v8 = vpop.f32.mrf.mxu0 }
 0x2e8   : > { %v2519_v31 = vadd.f32 %v2444_v8, %v2353_v23 }
 0x2e9   : > { %v2446_v10 = vpop.f32.mrf.mxu0 }
 0x2ea   : > { %v2349_v9 = vpop.f32.mrf.mxu1  ;;  %v2520_v35 = vadd.f32 %v2446_v10, %v2354_v28 }
 0x2eb   : > { %v2613_v12 = vpop.f32.mrf.mxu0  ;;  %v2355_v24 = vadd.f32 %v2349_v9, %v2187_v18 }
 0x2ec   : > { %v3649_v11 = vpop.f32.mrf.mxu1  ;;  %v2688_v38 = vadd.f32 %v2613_v12, %v2519_v31 }
 0x2ed   : > { %v2615_v15 = vpop.f32.mrf.mxu0 }
 0x2ee   : > { %v2515_v13 = vpop.f32.mrf.mxu1  ;;  %v2689_v42 = vadd.f32 %v2615_v15, %v2520_v35 }
 0x2ef   : > { %v2521_v32 = vadd.f32 %v2515_v13, %v2355_v24 }
 0x2f0   : > { %v3654_v14 = vpop.f32.mrf.mxu1 }
 0x2f2   : > { %v2684_v16 = vpop.f32.mrf.mxu1 }
 0x2f3   : > { %v2776_v19 = vpop.f32.mrf.mxu0  ;;  %v2690_v36 = vadd.f32 %v2684_v16, %v2521_v32 }
 0x2f4   : > { %v3659_v20 = vpop.f32.mrf.mxu1  ;;  %v2851_v43 = vadd.f32 %v2776_v19, %v2688_v38 }
 0x2f5   : > { %v2778_v25 = vpop.f32.mrf.mxu0 }
 0x2f6   : > { %v2847_v22 = vpop.f32.mrf.mxu1  ;;  %v2852_v48 = vadd.f32 %v2778_v25, %v2689_v42 }
 0x2f7   : > { %v2853_v39 = vadd.f32 %v2847_v22, %v2690_v36 }
 0x2f8   : > { %v3664_v27 = vpop.f32.mrf.mxu1 }
 0x2fa   : > { %v2939_v29 = vpop.f32.mrf.mxu0  ;;  %v3010_v30 = vpop.f32.mrf.mxu1 }
 0x2fb   : > { %v3016_v45 = vadd.f32 %v3010_v30, %v2853_v39  ;;  %v3014_v49 = vadd.f32 %v2939_v29, %v2851_v43 }
 0x2fc   : > { %v2941_v33 = vpop.f32.mrf.mxu0  ;;  %v3669_v34 = vpop.f32.mrf.mxu1 }
 0x2fd   : > { %v3015_v54 = vadd.f32 %v2941_v33, %v2852_v48 }
 0x2fe   : > { %v3173_v37 = vpop.f32.mrf.mxu1 }
 0x2ff   : > { %v3102_v40 = vpop.f32.mrf.mxu0  ;;  %v3179_v50 = vadd.f32 %v3173_v37, %v3016_v45 }
 0x300   : > { %v3674_v41 = vpop.f32.mrf.mxu1  ;;  %v3177_v55 = vadd.f32 %v3102_v40, %v3014_v49 }
 0x301   : > { %v3104_v51 = vpop.f32.mrf.mxu0 }
 0x302   : > { %v3336_v46 = vpop.f32.mrf.mxu1  ;;  %v3178_v58 = vadd.f32 %v3104_v51, %v3015_v54 }
 0x303   : > { %v3342_v56 = vadd.f32 %v3336_v46, %v3179_v50 }
 0x304   : > { %v3679_v53 = vpop.f32.mrf.mxu1 }
 0x305   : > { %v3355_v61 = vadd.f32 %v3352_v26, %v3342_v56 }
 0x306   : > { %v3265_v57 = vpop.f32.mrf.mxu0 }
 0x307   : > { %v3340_v60 = vadd.f32 %v3265_v57, %v3177_v55  ;;  %v3358_v1 = vmax.f32 %v3355_v61, 0.0 }
 0x308   : > { %v3267_v59 = vpop.f32.mrf.mxu0 }
 0x309   : > { %v3353_v62 = vadd.f32 %v3352_v26, %v3340_v60  ;;  %v3341_v63 = vadd.f32 %v3267_v59, %v3178_v58  ;;  %v3376_v2 = vrot.slane %v3358_v1, %v3986_v44 }
 0x30b   : > { %v3354_v0 = vadd.f32 %v3352_v26, %v3341_v63  ;;  %v3356_v3 = vmax.f32 %v3353_v62, 0.0 }
 0x30d   : > { %v3357_v4 = vmax.f32 %v3354_v0, 0.0 }
 0x30f   : > { %v3362_v5 = vcombine.low %v3356_v3, %v3357_v4 }
 0x311   : > { %v3369_v7 = vrot.slane %v3362_v5, %v3986_v44 }
 0x313   : > { %v3377_v8 = vcombine.low %v3369_v7, %v3376_v2 }
 0x315   : > { %v3384_v6 = vrot.slane %v3377_v8, %v3986_v44 }
 0x317   : > { %3386 = vst.msk [vmem:[%s253_s14] sm:$0x7] %vm3991_vm15, %v3384_v6 }
 0x318 PF: > { %s20_s25 = sadd.s32 1, %s3720_s25  }
 0x319   : > { %p17_p4 = scmp.ge.s32.totalorder %s20_s25, 4  }
 0x31b   :  { %19 = sbr.rel (!%p17_p4) target bundleno = 3 (0x3), region = 90 }

</bundles_post_ra>
